<compile_context>
chip_gen: v5e
topology: v5e:2x2
jax: 0.10.0
libtpu: 0.0.40
codegen_flags: <defaults>
</compile_context>

<pallas_src>
import functools

import jax
import jax.numpy as jnp
from jax.experimental import pallas as pl
from jax.experimental.pallas import tpu as pltpu

NEG_INF = -1e30  # finite "minus infinity" for padded action columns


def _round_up(x, m):
    return ((x + m - 1) // m) * m


def _choose_tile(batch, block_b):
    """Pick (tb, b_pad): tb is a multiple of 8 dividing b_pad, b_pad >= batch.

    Prefers a divisor of round_up(batch, 8) (no wrapper-side pad copy of the
    state array); falls back to padding only when no reasonable divisor
    exists. Splits a single-step grid in two for large batches so megacore
    (v7x) has something to shard.
    """
    b8 = _round_up(max(batch, 1), 8)
    rows = b8 // 8                       # number of 8-row groups
    cap = max(1, block_b // 8)
    if rows <= cap:
        tb, b_pad = b8, b8
    else:
        best, d = 1, 1
        while d * d <= rows:
            if rows % d == 0:
                for c in (d, rows // d):
                    if c <= cap and c > best:
                        best = c
            d += 1
        if best * 8 * 2 >= block_b:      # divisor tile close enough to target
            tb, b_pad = best * 8, b8
        else:                            # pathological (e.g. 8*prime): pad
            tb = block_b
            b_pad = _round_up(b8, tb)
    # v7x megacore: avoid a 1-step grid for big batches so both TCs get work.
    if b_pad // tb == 1 and tb >= 1024 and (tb // 8) % 2 == 0:
        tb //= 2
    return tb, b_pad


def behavior_policy_kernel(x_ref, w1_ref, b1_ref, w2_ref, b2_ref,
                           w3_ref, b3_ref, thr_ref, probs_ref, mask_ref):
    # MXU operands in the weight dtype (bf16), f32 accumulation; all VPU/EUP
    # work (bias add, ReLU, exp, divide) stays f32.
    cd = w1_ref.dtype
    a = probs_ref.shape[-1]              # true action count (unpadded)

    x = x_ref[...].astype(cd)

    # ---- Linear 1 + ReLU ----
    h1 = jnp.dot(x, w1_ref[...], preferred_element_type=jnp.float32)
    h1 = jnp.maximum(h1 + b1_ref[...], 0.0)            # (TB, H1) f32

    # ---- Linear 2 + ReLU ----
    h2 = jnp.dot(h1.astype(cd), w2_ref[...], preferred_element_type=jnp.float32)
    h2 = jnp.maximum(h2 + b2_ref[...], 0.0)            # (TB, H2) f32

    # ---- Linear 3 (logits, internally padded to 128 lanes) ----
    logits = jnp.dot(h2.astype(cd), w3_ref[...], preferred_element_type=jnp.float32)
    logits = logits + b3_ref[...]                       # padded cols -> -1e30

    # ---- numerically stable softmax over the (padded) action axis ----
    m = jnp.max(logits, axis=-1, keepdims=True)
    e = jnp.exp(logits - m)                             # padded cols -> exactly 0
    denom = jnp.sum(e, axis=-1, keepdims=True)
    p = e[:, :a] / denom                                # exact normalization

    probs_ref[...] = p.astype(probs_ref.dtype)
    # Fused `.sample` threshold (scalar lives in SMEM) -> free VPU filler.
    mask_ref[...] = (p > thr_ref[0, 0]).astype(mask_ref.dtype)


def init_params(key, state_size, action_size, hidden_sizes=(64, 128)):
    """f32 params mimicking PyTorch nn.Linear default init; W stored (in, out)."""
    sizes = [state_size, hidden_sizes[0], hidden_sizes[1], action_size]
    params = {}
    for i in range(3):
        fan_in, fan_out = sizes[i], sizes[i + 1]
        key, kw, kb = jax.random.split(key, 3)
        bound = 1.0 / jnp.sqrt(fan_in)
        params[f"w{i + 1}"] = jax.random.uniform(
            kw, (fan_in, fan_out), jnp.float32, minval=-bound, maxval=bound)
        params[f"b{i + 1}"] = jax.random.uniform(
            kb, (1, fan_out), jnp.float32, minval=-bound, maxval=bound)
    return params


def pack_params(params, *, lane_pad=128, weight_dtype=jnp.bfloat16):
    """Pad the action dim of (w3, b3) to a lane-dense width and cast weights
    to the MXU dtype. Padded logit columns get bias NEG_INF so softmax gives
    them probability exactly 0. Biases stay f32 (VPU work is f32)."""
    w3, b3 = params["w3"], params["b3"]
    h2, a = w3.shape
    ap = _round_up(max(a, lane_pad), lane_pad)
    w3_p = jnp.zeros((h2, ap), jnp.float32).at[:, :a].set(w3)
    b3_p = jnp.full((1, ap), NEG_INF, jnp.float32).at[:, :a].set(b3)
    return {
        "w1": params["w1"].astype(weight_dtype),
        "b1": params["b1"].astype(jnp.float32),
        "w2": params["w2"].astype(weight_dtype),
        "b2": params["b2"].astype(jnp.float32),
        "w3": w3_p.astype(weight_dtype),
        "b3": b3_p,
    }


@functools.partial(jax.jit, static_argnames=("action_size", "block_b"))
def _behavior_policy_call(state, packed, threshold, action_size, block_b):
    """Fused forward + threshold mask. Returns (probs (B,A), mask (B,A))."""
    w1, b1 = packed["w1"], packed["b1"]
    w2, b2 = packed["w2"], packed["b2"]
    w3, b3 = packed["w3"], packed["b3"]

    B, S = state.shape
    H1, H2 = w1.shape[1], w2.shape[1]
    AP = w3.shape[1]
    A = action_size

    block_b = _round_up(max(block_b, 8), 8)
    tb, b_pad = _choose_tile(B, block_b)
    if b_pad != B:
        state = jnp.pad(state, ((0, b_pad - B), (0, 0)))
    grid = (b_pad // tb,)

    resident = lambda shape: pl.BlockSpec(shape, lambda i: (0, 0))

    param_bytes = sum(int(v.size) * v.dtype.itemsize
                      for v in (w1, b1, w2, b2, w3, b3))
    cost = pl.CostEstimate(
        flops=2 * b_pad * (S * H1 + H1 * H2 + H2 * AP),
        transcendentals=b_pad * AP,
        bytes_accessed=b_pad * S * 4 + 2 * b_pad * A * 4 + param_bytes,
    )

    probs, mask = pl.pallas_call(
        behavior_policy_kernel,
        out_shape=(
            jax.ShapeDtypeStruct((b_pad, A), jnp.float32),
            jax.ShapeDtypeStruct((b_pad, A), jnp.float32),
        ),
        grid=grid,
        in_specs=[
            pl.BlockSpec((tb, S), lambda i: (i, 0)),     # streamed batch tile
            resident(w1.shape), resident(b1.shape),      # VMEM-resident params
            resident(w2.shape), resident(b2.shape),
            resident(w3.shape), resident(b3.shape),
            pl.BlockSpec(memory_space=pltpu.MemorySpace.SMEM),  # threshold
        ],
        out_specs=(
            pl.BlockSpec((tb, A), lambda i: (i, 0)),     # narrow, no 128-pad
            pl.BlockSpec((tb, A), lambda i: (i, 0)),
        ),
        compiler_params=pltpu.CompilerParams(
            dimension_semantics=("parallel",)),          # megacore on v7x
        cost_estimate=cost,
    )(state, w1, b1, w2, b2, w3, b3, threshold)

    return probs[:B], mask[:B]


def behavior_policy_forward(state, packed, action_size, *, block_b=1024):
    """state: (B, S) f32 -> (B, action_size) softmax probabilities."""
    thr = jnp.zeros((1, 1), jnp.float32)
    probs, _ = _behavior_policy_call(state, packed, thr,
                                     action_size=action_size, block_b=block_b)
    return probs


def behavior_policy_sample(state, packed, action_size, threshold=0.1, *,
                           block_b=1024):
    """Mask of actions whose probability exceeds `threshold` (PyTorch .sample)."""
    thr = jnp.full((1, 1), threshold, jnp.float32)
    _, mask = _behavior_policy_call(state, packed, thr,
                                    action_size=action_size, block_b=block_b)
    return mask


if __name__ == "__main__":
    STATE, ACTION = 32, 8
    key = jax.random.PRNGKey(0)

    params = init_params(key, STATE, ACTION, hidden_sizes=(64, 128))
    packed = pack_params(params)

    # Pure-JAX references.
    def ref_fwd_f32(x, p):
        h1 = jnp.maximum(x @ p["w1"] + p["b1"], 0.0)
        h2 = jnp.maximum(h1 @ p["w2"] + p["b2"], 0.0)
        return jax.nn.softmax(h2 @ p["w3"] + p["b3"], axis=-1)

    def ref_fwd_matched(x, pk, a):       # same bf16-in / f32-acc arithmetic
        cd = pk["w1"].dtype
        h1 = jnp.maximum(
            jnp.dot(x.astype(cd), pk["w1"], preferred_element_type=jnp.float32)
            + pk["b1"], 0.0)
        h2 = jnp.maximum(
            jnp.dot(h1.astype(cd), pk["w2"], preferred_element_type=jnp.float32)
            + pk["b2"], 0.0)
        logits = jnp.dot(h2.astype(cd), pk["w3"],
                         preferred_element_type=jnp.float32) + pk["b3"]
        return jax.nn.softmax(logits, axis=-1)[:, :a]

    # Small batch (pads 4->8), non-tile-aligned batch (divisor tile, no pad),
    # and a 2-step pipelined/megacore grid.
    for B in (4, 1000, 2048):
        key, k_state = jax.random.split(key)
        state = jax.random.normal(k_state, (B, STATE), dtype=jnp.float32)

        probs = jax.block_until_ready(
            behavior_policy_forward(state, packed, ACTION))

        assert probs.shape == (B, ACTION)
        assert jnp.allclose(jnp.sum(probs, axis=-1), 1.0, atol=1e-5)
        # Tight check vs. a reference using identical bf16/f32 arithmetic.
        assert jnp.allclose(probs, ref_fwd_matched(state, packed, ACTION),
                            atol=2e-3)
        # Looser semantic check vs. the full-precision f32 reference.
        assert jnp.allclose(probs, ref_fwd_f32(state, params), atol=5e-2)

        mask = jax.block_until_ready(
            behavior_policy_sample(state, packed, ACTION, threshold=0.1))
        assert mask.shape == (B, ACTION)
        assert jnp.all((mask == 0.0) | (mask == 1.0))
        assert jnp.array_equal(mask, (probs > 0.1).astype(jnp.float32))

    print("KERNEL_OK")
</pallas_src>

<mosaic_0001>
module attributes {stable_mosaic.version = 11 : i64} {
  func.func @behavior_policy_kernel(%arg0: i32, %arg1: memref<8x32xf32, #tpu.memory_space<vmem>>, %arg2: memref<32x64xbf16, #tpu.memory_space<vmem>>, %arg3: memref<1x64xf32, #tpu.memory_space<vmem>>, %arg4: memref<64x128xbf16, #tpu.memory_space<vmem>>, %arg5: memref<1x128xf32, #tpu.memory_space<vmem>>, %arg6: memref<128x128xbf16, #tpu.memory_space<vmem>>, %arg7: memref<1x128xf32, #tpu.memory_space<vmem>>, %arg8: memref<1x1xf32, #tpu.memory_space<smem>>, %arg9: memref<8x8xf32, #tpu.memory_space<vmem>>, %arg10: memref<8x8xf32, #tpu.memory_space<vmem>>) attributes {dimension_semantics = [#tpu.dimension_semantics<parallel>], iteration_bounds = array<i64: 1>, scalar_prefetch = 0 : i64, scratch_operands = 0 : i64, tpu.core_type = #tpu.core_type<tc>, window_params = [{transform_indices = @transform_0, window_bounds = array<i64: 8, 32>}, {pipeline_mode = #tpu.pipeline_mode<synchronous>, transform_indices = @transform_1, window_bounds = array<i64: 32, 64>}, {pipeline_mode = #tpu.pipeline_mode<synchronous>, transform_indices = @transform_2, window_bounds = array<i64: 1, 64>}, {pipeline_mode = #tpu.pipeline_mode<synchronous>, transform_indices = @transform_3, window_bounds = array<i64: 64, 128>}, {pipeline_mode = #tpu.pipeline_mode<synchronous>, transform_indices = @transform_4, window_bounds = array<i64: 1, 128>}, {pipeline_mode = #tpu.pipeline_mode<synchronous>, transform_indices = @transform_5, window_bounds = array<i64: 128, 128>}, {pipeline_mode = #tpu.pipeline_mode<synchronous>, transform_indices = @transform_6, window_bounds = array<i64: 1, 128>}, {transform_indices = @transform_7, window_bounds = array<i64: 1, 1>}, {transform_indices = @transform_8, window_bounds = array<i64: 8, 8>}, {transform_indices = @transform_9, window_bounds = array<i64: 8, 8>}]} {
    %c0 = arith.constant 0 : index
    %c0_0 = arith.constant 0 : index
    %0 = vector.load %arg1[%c0, %c0_0] : memref<8x32xf32, #tpu.memory_space<vmem>>, vector<8x32xf32>
    %1 = arith.truncf %0 : vector<8x32xf32> to vector<8x32xbf16>
    %c0_1 = arith.constant 0 : index
    %c0_2 = arith.constant 0 : index
    %2 = vector.load %arg2[%c0_1, %c0_2] : memref<32x64xbf16, #tpu.memory_space<vmem>>, vector<32x64xbf16>
    %cst = arith.constant dense<0.000000e+00> : vector<8x64xf32>
    %3 = tpu.matmul %1, %2, %cst {dimension_numbers = #tpu.dot_dimension_numbers<[1], [0], [0], [1], [0, 0, 1, 1], [], []>} : vector<8x32xbf16>, vector<32x64xbf16>, vector<8x64xf32> -> vector<8x64xf32>
    %c0_3 = arith.constant 0 : index
    %c0_4 = arith.constant 0 : index
    %4 = vector.load %arg3[%c0_3, %c0_4] : memref<1x64xf32, #tpu.memory_space<vmem>>, vector<1x64xf32>
    %5 = vector.broadcast %4 : vector<1x64xf32> to vector<8x64xf32>
    %6 = arith.addf %3, %5 : vector<8x64xf32>
    %cst_5 = arith.constant 0.000000e+00 : f32
    %7 = vector.broadcast %cst_5 : f32 to vector<8x64xf32>
    %8 = arith.maximumf %6, %7 : vector<8x64xf32>
    %9 = arith.truncf %8 : vector<8x64xf32> to vector<8x64xbf16>
    %c0_6 = arith.constant 0 : index
    %c0_7 = arith.constant 0 : index
    %10 = vector.load %arg4[%c0_6, %c0_7] : memref<64x128xbf16, #tpu.memory_space<vmem>>, vector<64x128xbf16>
    %cst_8 = arith.constant dense<0.000000e+00> : vector<8x128xf32>
    %11 = tpu.matmul %9, %10, %cst_8 {dimension_numbers = #tpu.dot_dimension_numbers<[1], [0], [0], [1], [0, 0, 1, 1], [], []>} : vector<8x64xbf16>, vector<64x128xbf16>, vector<8x128xf32> -> vector<8x128xf32>
    %c0_9 = arith.constant 0 : index
    %c0_10 = arith.constant 0 : index
    %12 = vector.load %arg5[%c0_9, %c0_10] : memref<1x128xf32, #tpu.memory_space<vmem>>, vector<1x128xf32>
    %13 = vector.broadcast %12 : vector<1x128xf32> to vector<8x128xf32>
    %14 = arith.addf %11, %13 : vector<8x128xf32>
    %cst_11 = arith.constant 0.000000e+00 : f32
    %15 = vector.broadcast %cst_11 : f32 to vector<8x128xf32>
    %16 = arith.maximumf %14, %15 : vector<8x128xf32>
    %17 = arith.truncf %16 : vector<8x128xf32> to vector<8x128xbf16>
    %c0_12 = arith.constant 0 : index
    %c0_13 = arith.constant 0 : index
    %18 = vector.load %arg6[%c0_12, %c0_13] : memref<128x128xbf16, #tpu.memory_space<vmem>>, vector<128x128xbf16>
    %cst_14 = arith.constant dense<0.000000e+00> : vector<8x128xf32>
    %19 = tpu.matmul %17, %18, %cst_14 {dimension_numbers = #tpu.dot_dimension_numbers<[1], [0], [0], [1], [0, 0, 1, 1], [], []>} : vector<8x128xbf16>, vector<128x128xbf16>, vector<8x128xf32> -> vector<8x128xf32>
    %c0_15 = arith.constant 0 : index
    %c0_16 = arith.constant 0 : index
    %20 = vector.load %arg7[%c0_15, %c0_16] : memref<1x128xf32, #tpu.memory_space<vmem>>, vector<1x128xf32>
    %21 = vector.broadcast %20 : vector<1x128xf32> to vector<8x128xf32>
    %22 = arith.addf %19, %21 : vector<8x128xf32>
    %cst_17 = arith.constant dense<0xFF800000> : vector<8xf32>
    %23 = vector.multi_reduction <maximumf>, %22, %cst_17 [1] : vector<8x128xf32> to vector<8xf32>
    %24 = vector.shape_cast %23 : vector<8xf32> to vector<8x1xf32>
    %25 = vector.broadcast %24 : vector<8x1xf32> to vector<8x128xf32>
    %26 = arith.subf %22, %25 : vector<8x128xf32>
    %27 = math.exp %26 : vector<8x128xf32>
    %cst_18 = arith.constant dense<0.000000e+00> : vector<8xf32>
    %28 = vector.multi_reduction <add>, %27, %cst_18 [1] : vector<8x128xf32> to vector<8xf32>
    %29 = vector.shape_cast %28 : vector<8xf32> to vector<8x1xf32>
    %30 = vector.extract_strided_slice %27 {offsets = [0, 0], sizes = [8, 8], strides = [1, 1]} : vector<8x128xf32> to vector<8x8xf32>
    %31 = vector.broadcast %29 : vector<8x1xf32> to vector<8x8xf32>
    %32 = arith.divf %30, %31 : vector<8x8xf32>
    %c0_19 = arith.constant 0 : index
    %c0_20 = arith.constant 0 : index
    %33 = vector.load %arg9[%c0_19, %c0_20] : memref<8x8xf32, #tpu.memory_space<vmem>>, vector<8x8xf32>
    tpu.vector_store %arg9[%c0_19, %c0_20], %32 {strides = array<i32>} : memref<8x8xf32, #tpu.memory_space<vmem>>, vector<8x8xf32>,
    %c0_21 = arith.constant 0 : index
    %c0_22 = arith.constant 0 : index
    %34 = memref.load %arg8[%c0_21, %c0_22] : memref<1x1xf32, #tpu.memory_space<smem>>
    %35 = vector.broadcast %34 : f32 to vector<8x8xf32>
    %36 = arith.cmpf ogt, %32, %35 : vector<8x8xf32>
    %37 = arith.extui %36 : vector<8x8xi1> to vector<8x8xi32>
    %38 = arith.sitofp %37 : vector<8x8xi32> to vector<8x8xf32>
    %c0_23 = arith.constant 0 : index
    %c0_24 = arith.constant 0 : index
    %39 = vector.load %arg10[%c0_23, %c0_24] : memref<8x8xf32, #tpu.memory_space<vmem>>, vector<8x8xf32>
    tpu.vector_store %arg10[%c0_23, %c0_24], %38 {strides = array<i32>} : memref<8x8xf32, #tpu.memory_space<vmem>>, vector<8x8xf32>,
    return
  }
  func.func @transform_0(%arg0: i32) -> (i32, i32) {
    %c0_i32 = arith.constant 0 : i32
    %c0_i32_0 = arith.constant 0 : i32
    return %arg0, %c0_i32 : i32, i32
  }
  func.func @transform_1(%arg0: i32) -> (i32, i32) {
    %c0_i32 = arith.constant 0 : i32
    %c0_i32_0 = arith.constant 0 : i32
    %c0_i32_1 = arith.constant 0 : i32
    return %c0_i32, %c0_i32_0 : i32, i32
  }
  func.func @transform_2(%arg0: i32) -> (i32, i32) {
    %c0_i32 = arith.constant 0 : i32
    %c0_i32_0 = arith.constant 0 : i32
    %c0_i32_1 = arith.constant 0 : i32
    return %c0_i32, %c0_i32_0 : i32, i32
  }
  func.func @transform_3(%arg0: i32) -> (i32, i32) {
    %c0_i32 = arith.constant 0 : i32
    %c0_i32_0 = arith.constant 0 : i32
    %c0_i32_1 = arith.constant 0 : i32
    return %c0_i32, %c0_i32_0 : i32, i32
  }
  func.func @transform_4(%arg0: i32) -> (i32, i32) {
    %c0_i32 = arith.constant 0 : i32
    %c0_i32_0 = arith.constant 0 : i32
    %c0_i32_1 = arith.constant 0 : i32
    return %c0_i32, %c0_i32_0 : i32, i32
  }
  func.func @transform_5(%arg0: i32) -> (i32, i32) {
    %c0_i32 = arith.constant 0 : i32
    %c0_i32_0 = arith.constant 0 : i32
    %c0_i32_1 = arith.constant 0 : i32
    return %c0_i32, %c0_i32_0 : i32, i32
  }
  func.func @transform_6(%arg0: i32) -> (i32, i32) {
    %c0_i32 = arith.constant 0 : i32
    %c0_i32_0 = arith.constant 0 : i32
    %c0_i32_1 = arith.constant 0 : i32
    return %c0_i32, %c0_i32_0 : i32, i32
  }
  func.func @transform_7(%arg0: i32) -> (i32, i32) {
    %c0_i32 = arith.constant 0 : i32
    %c0_i32_0 = arith.constant 0 : i32
    %c0_i32_1 = arith.constant 0 : i32
    return %c0_i32, %c0_i32_0 : i32, i32
  }
  func.func @transform_8(%arg0: i32) -> (i32, i32) {
    %c0_i32 = arith.constant 0 : i32
    %c0_i32_0 = arith.constant 0 : i32
    return %arg0, %c0_i32 : i32, i32
  }
  func.func @transform_9(%arg0: i32) -> (i32, i32) {
    %c0_i32 = arith.constant 0 : i32
    %c0_i32_0 = arith.constant 0 : i32
    return %arg0, %c0_i32 : i32, i32
  }
}

</mosaic_0001>

<bundles_post_ra>
// kernel: _behavior_policy_call.1
= control target key start
LH: loop header
LB: loop body
LE: loop exit
PB: predicated region body
PF: predicated region fallthrough
CT: control target
= control target key end

     0   :  { %16 = vsyncpa [#allocation4], 0  ;;  %s546_s0 = inlined_call_operand.vmem [shape: f32[8,32], index: 0, kind: input, shape index: {}]   ;;  %s547_s1 = inlined_call_operand.vmem [shape: bf16[32,64], index: 1, kind: input, shape index: {}]   ;;  %s548_s2 = inlined_call_operand.vmem [shape: f32[1,64], index: 2, kind: input, shape index: {}]   ;;  %s549_s3 = inlined_call_operand.hbm [shape: bf16[64,128], index: 3, kind: input, shape index: {}]   ;;  %s550_s4 = inlined_call_operand.vmem [shape: f32[1,128], index: 4, kind: input, shape index: {}]   ;;  %s551_s5 = inlined_call_operand.hbm [shape: bf16[128,128], index: 5, kind: input, shape index: {}]   ;;  %s552_s6 = inlined_call_operand.hbm [shape: f32[1,128], index: 6, kind: input, shape index: {}]   ;;  %s553_s7 = inlined_call_operand.<no memory space> [shape: f32[1,1], index: 7, kind: input, shape index: {}]   ;;  %s554_s8 = inlined_call_operand.vmem [shape: f32[8,8], index: 8, kind: output, shape index: {0}]   ;;  %s555_s9 = inlined_call_operand.vmem [shape: f32[8,8], index: 9, kind: output, shape index: {1}]  }
   0x1   :  { %17 = vsyncpa [#allocation6], 0  ;;  %s43_s11 = sshll.u32 %s551_s5, 4  ;;  %s457_s12 = smov [#allocation5]   ;;  %s44_s11 = int_to_ptr.hbm [resolvable:$true] %s43_s11 }
   0x2   :  { %s45_s13 = sshll.u32 %s457_s12, 4  ;;  %s28_s16 = sshll.u32 %s549_s3, 4  ;;  %s46_s13 = int_to_ptr.vmem [resolvable:$true] %s45_s13  ;;  %s29_s16 = int_to_ptr.hbm [resolvable:$true] %s28_s16 }
   0x3   :  { %s458_s17 = smov 64   ;;  %s459_s18 = smov 4  }
   0x4   :  { %51 = dma.hbm_to_vmem [thread:$0]  %s44_s11, 1024, %s46_s13, [#allocation6], %s458_s17, %s458_s17, %s459_s18  }
   0x5   :  { %s460_s19 = smov [#allocation3]   ;;  %s57_s23 = sshll.u32 %s552_s6, 4  ;;  %s58_s23 = int_to_ptr.hbm [resolvable:$true] %s57_s23 }
   0x6   :  { %s30_s20 = sshll.u32 %s460_s19, 4  ;;  %s461_s5 = smov [#allocation7]   ;;  %s31_s20 = int_to_ptr.vmem [resolvable:$true] %s30_s20 }
   0x7   :  { %36 = dma.hbm_to_vmem [thread:$0]  %s29_s16, 512, %s31_s20, [#allocation4], %s458_s17, %s458_s17, %s459_s18  }
   0x8   :  { %s59_s24 = sshll.u32 %s461_s5, 4  ;;  %s60_s24 = int_to_ptr.vmem [resolvable:$true] %s59_s24 }
   0x9   :  { %62 = dma.hbm_to_vmem [thread:$0]  %s58_s23, 16, %s60_s24, [#allocation6]  }
   0xa   :  { %453 = dma.done.wait [#allocation4], 512  }
   0xb   :  { %454 = vsyncadd [#allocation4], 4294966784 }
   0xc   :  { %455 = dma.done.wait [#allocation6], 1040  }
   0xd   :  { %456 = vsyncadd [#allocation6], 4294966256  ;;  %v355_v0 = vld [vmem:[%s547_s1 + $0x8] sm:$0xff]  ;;  %v354_v1 = vld [vmem:[%s547_s1] sm:$0xff]  ;;  %vm100_vm0 = vcmask 261120   ;;  %vm155_vm1 = vcmask 523264   ;;  %v280_v46 = vstv %s553_s7 }
   0xe   :  { %v359_v2 = vld [vmem:[#allocation3 + $0x18] sm:$0xff]  ;;  %110 = vmatpush.bf16.msra.mxu0 %v355_v0  ;;  %v78_v3 = vld [vmem:[%s546_s0] sm:$0xff]  ;;  %v358_v4 = vld [vmem:[#allocation3 + $0x10] sm:$0xff]  ;;  %vm277_vm6 = vcmask 64512   ;;  %v462_v49 = vmov 0.0  }
   0xf   :  { %163 = vmatpush.bf16.msra.mxu1 %v359_v2  ;;  %v79_v5 = vpack.c.bf16 %v78_v3, %v78_v3  ;;  %v357_v6 = vld [vmem:[#allocation3 + $0x8] sm:$0xff]  ;;  %v356_v7 = vld [vmem:[#allocation3] sm:$0xff]  ;;  %v367_v8 = vld [vmem:[#allocation5 + $0x38] sm:$0xff] }
  0x10   :  { %242 = vmatpush.bf16.msra.mxu2 %v367_v8  ;;  %v366_v9 = vld [vmem:[#allocation5 + $0x30] sm:$0xff]  ;;  %v365_v10 = vld [vmem:[#allocation5 + $0x28] sm:$0xff]  ;;  %v364_v11 = vld [vmem:[#allocation5 + $0x20] sm:$0xff] }
  0x11   :  { %v363_v12 = vld [vmem:[#allocation5 + $0x18] sm:$0xff]  ;;  %v362_v13 = vld [vmem:[#allocation5 + $0x10] sm:$0xff]  ;;  %v374_v14 = vld [vmem:[%s548_s2] ss:$0 sm:$0xff] }
  0x12   :  { %111 = vmatpush.bf16.msra.mxu0 %v354_v1  ;;  %v361_v20 = vld [vmem:[#allocation5 + $0x8] sm:$0xff]  ;;  %v360_v21 = vld [vmem:[#allocation5] sm:$0xff] }
  0x13   :  { %164 = vmatpush.bf16.msra.mxu1 %v358_v4  ;;  %v375_v22 = vld [vmem:[%s550_s4] ss:$0 sm:$0xff] }
  0x14   :  { %243 = vmatpush.bf16.msra.mxu2 %v366_v9  ;;  %v376_v28 = vld [vmem:[#allocation7] ss:$0 sm:$0xff] }
  0x15   :  { %303 = vmatmul.msk.bf16.vlgmr.msra.gmra.mxu0 %vm100_vm0, %v79_v5 }
  0x17   :  { %165 = vmatpush.bf16.msra.mxu1 %v357_v6 }
  0x18   :  { %244 = vmatpush.bf16.msra.mxu2 %v365_v10 }
  0x1b   :  { %166 = vmatpush.bf16.msra.mxu1 %v356_v7 }
  0x1c   :  { %245 = vmatpush.bf16.msra.mxu2 %v364_v11 }
  0x20   :  { %246 = vmatpush.bf16.msra.mxu2 %v363_v12 }
  0x24   :  { %247 = vmatpush.bf16.msra.mxu2 %v362_v13 }
  0x28   :  { %248 = vmatpush.bf16.msra.mxu2 %v361_v20 }
  0x2c   :  { %249 = vmatpush.bf16.msra.mxu2 %v360_v21 }
  0x92   :  { %v113_v15 = vpop.f32.mrf.mxu0 }
  0x93   :  { %v114_v16 = vadd.f32 %v374_v14, %v113_v15 }
  0x95   :  { %v117_v17 = vmax.f32 %v114_v16, 0.0 }
  0x97   :  { %v118_v18 = vpack.c.bf16 %v117_v17, %v117_v17 }
  0x99   :  { %320 = vmatmul.msk.bf16.vlgmr.msra.gmra.mxu1 %vm155_vm1, %v118_v18 }
  0x9a   :  { %v115_v19 = vpop.f32.mrf.mxu0 }
 0x116   :  { %v168_v23 = vpop.f32.mrf.mxu1 }
 0x117   :  { %v169_v24 = vadd.f32 %v375_v22, %v168_v23 }
 0x119   :  { %v172_v25 = vmax.f32 %v169_v24, 0.0 }
 0x11b   :  { %v173_v26 = vpack.c.bf16 %v172_v25, %v172_v25 }
 0x11d   :  { %250 = vmatmul.bf16.vlgmr.msra.gmra.mxu2 %v173_v26 }
 0x11e   :  { %v170_v27 = vpop.f32.mrf.mxu1 }
 0x1a0   :  { %v251_v29 = vpop.f32.mrf.mxu2 }
 0x1a1   :  { %v252_v30 = vadd.f32 %v376_v28, %v251_v29 }
 0x1a3   :  { %255 = vmax.xlane.f32.xlu0 %v252_v30 }
 0x1a8   :  { %v253_v31 = vpop.f32.mrf.mxu2 }
 0x216   :  { %v256_v32 = vpop.xlane.xlu0 %255 }
 0x217   :  { %v257_v33 = vsub.f32 %v252_v30, %v256_v32 }
 0x219   :  { %v258_v34 = vmul.f32 1.442695, %v257_v33 }
 0x21b   :  { %377 = vpow2.f32 %v258_v34 }
 0x221   :  { %v378_v35 = vpop.eup %377 }
 0x222   :  { %260 = vadd.xlane.f32.xlu0 %v378_v35 }
 0x295   :  { %v261_v36 = vpop.xlane.xlu0 %260 }
 0x296   :  { %379 = vrcp.f32 %v261_v36  ;;  %v273_v40 = vand.u32 2147483648, %v261_v36  ;;  %v271_v42 = vand.u32 2147483647, %v261_v36  ;;  %vm267_vm3 = vweird.f32 %v261_v36 }
 0x298   :  { %v274_v44 = vor.u32 1.1754944e-38, %v273_v40  ;;  %vm272_vm5 = vcmp.eq.f32.partialorder %v271_v42, 8.507059e+37 }
 0x29c   :  { %v380_v37 = vpop.eup %379 }
 0x29d   :  { %v263_v38 = vmul.f32 %v380_v37, %v261_v36  ;;  %vm268_vm2 = vweird.f32 %v380_v37 }
 0x29e   :  { %vm269_vm4 = vmor %vm267_vm3, %vm268_vm2 }
 0x29f   :  { %v264_v39 = vsub.f32 1.0, %v263_v38 }
 0x2a1   :  { %v265_v41 = vmul.f32 %v380_v37, %v264_v39 }
 0x2a3   :  { %v266_v43 = vadd.f32 %v380_v37, %v265_v41 }
 0x2a5   :  { %v270_v45 = vsel %vm269_vm4, %v380_v37, %v266_v43 }
 0x2a6   :  { %v275_v47 = vsel %vm272_vm5, %v274_v44, %v270_v45 }
 0x2a7   :  { %v276_v48 = vmul.f32 %v378_v35, %v275_v47 }
 0x2a9   :  { %278 = vst.msk [vmem:[%s554_s8] sm:$0xff] %vm277_vm6, %v276_v48  ;;  %vm281_vm7 = vcmp.gt.f32.partialorder %v276_v48, %v280_v46 }
 0x2aa   :  { %v353_v50 = vsel %vm281_vm7, 1.0, %v462_v49 }
 0x2ab   :  { %284 = vst.msk [vmem:[%s555_s9] sm:$0xff] %vm277_vm6, %v353_v50 }
 0x2ac   :  { %293 = vsyncpa [#allocation4], 1 }
 0x2ad   :  { %294 = vsyncpa [#allocation6], 1 }

</bundles_post_ra>
